<compile_context>
chip_gen: v7x
topology: tpu7x:2x2x1
jax: 0.10.0
libtpu: 0.0.40
codegen_flags: <defaults>
</compile_context>

<pallas_src>
import functools

import jax
import jax.numpy as jnp
from jax.experimental import pallas as pl
from jax.experimental.pallas import tpu as pltpu


def _focal_loss_kernel(logits_ref, targets_ref, alpha_t_ref, out_ref, acc_ref,
                       *, gamma, total_n, inner_tiles, tile_n):
    p = pl.program_id(0)   # parallel axis (megacore split of the batch)
    j = pl.program_id(1)   # arbitrary axis (sequential reduction over tiles)

    @pl.when(j == 0)
    def _():
        acc_ref[...] = jnp.zeros_like(acc_ref)

    logits = logits_ref[...].astype(jnp.float32)        # (TN, C)
    tgt = targets_ref[...]                              # (TN, 1) int32
    alpha_t = alpha_t_ref[...].astype(jnp.float32)      # (TN, 1)

    # Stable log-sum-exp over classes (lane axis).
    m = jnp.max(logits, axis=-1, keepdims=True)                           # (TN, 1)
    shifted = logits - m
    lse = jnp.log(jnp.sum(jnp.exp(shifted), axis=-1, keepdims=True)) + m  # (TN, 1)

    # One-hot gather of the target logit.
    col = jax.lax.broadcasted_iota(jnp.int32, logits.shape, 1)            # (TN, C)
    onehot = (col == tgt).astype(jnp.float32)                             # (TN, C)
    tgt_logit = jnp.sum(onehot * logits, axis=-1, keepdims=True)          # (TN, 1)

    ce = lse - tgt_logit                                                  # (TN, 1)
    pt = jnp.exp(-ce)
    one_minus_pt = 1.0 - pt
    g = float(gamma)
    if g == 2.0:
        modulating = one_minus_pt * one_minus_pt
    elif g == float(int(g)) and g >= 0.0:
        modulating = one_minus_pt ** int(g)
    else:
        # Clamp: ce can round slightly below 0, making (1 - pt) a tiny negative number,
        # and pow(negative, non-integer) is NaN.
        modulating = jnp.power(jnp.maximum(one_minus_pt, 0.0), jnp.float32(g))

    focal = alpha_t * modulating * ce                                     # (TN, 1)

    # Row-validity mask: handles the partial last tile and duplicated clamp tiles.
    block_start = (p * inner_tiles + j) * tile_n
    rows = jax.lax.broadcasted_iota(jnp.int32, focal.shape, 0) + block_start
    focal = jnp.where(rows < total_n, focal, 0.0)

    # Per-row accumulation; collapse to a scalar only once, on the last step.
    acc_ref[...] += focal

    @pl.when(j == pl.num_programs(1) - 1)
    def _():
        out_ref[...] = jnp.sum(acc_ref[...]).reshape(1, 1, 1)


def focal_loss(logits, targets, alpha=None, gamma=2.0, reduction="mean", *,
               tile_n=None, block_bytes_budget=8 << 20, num_parallel=2):
    """Focal loss. logits: (N, C) float (f32 or bf16), targets: (N,) int, alpha: (C,) or None."""
    n, c = logits.shape
    targets = targets.astype(jnp.int32)

    # Hoist the per-class alpha gather out of the kernel (cheap O(N) gather in XLA).
    if alpha is None:
        alpha_t = jnp.ones((n,), jnp.float32)
    else:
        alpha_t = jnp.asarray(alpha, jnp.float32)[targets]

    targets2d = targets.reshape(n, 1)
    alpha_t2d = alpha_t.reshape(n, 1)

    # Auto-size the batch tile from a VMEM byte budget for the logits block.
    row_bytes = max(1, c * logits.dtype.itemsize)
    if tile_n is None:
        tile_n = (block_bytes_budget // row_bytes) // 8 * 8
        tile_n = int(max(8, min(1024, tile_n)))
    max_rows = ((n // 8) * 8) if n >= 8 else 8
    tile_n = int(min(tile_n, max(8, max_rows)))

    num_tiles = pl.cdiv(n, tile_n)
    num_par = int(max(1, min(num_parallel, num_tiles)))   # leading parallel axis (2 TCs on v7x)
    inner_tiles = pl.cdiv(num_tiles, num_par)

    # Clamp the block index so padded grid points never DMA fully out of bounds;
    # the kernel masks those rows out via the (unclamped) global row index.
    def idx(p_, j_):
        return (jnp.minimum(p_ * inner_tiles + j_, num_tiles - 1), 0)

    # Double-buffered inputs + scratch, with margin; > v5e's 16 MiB default scoped limit,
    # well within v7x's 64 MiB physical VMEM.
    approx_vmem = 2 * (tile_n * row_bytes + 2 * tile_n * 4) + tile_n * 4 + 4096
    vmem_limit = int(min(40 << 20, max(24 << 20, 2 * approx_vmem + (2 << 20))))

    kernel = functools.partial(_focal_loss_kernel, gamma=gamma, total_n=n,
                               inner_tiles=inner_tiles, tile_n=tile_n)

    partials = pl.pallas_call(
        kernel,
        out_shape=jax.ShapeDtypeStruct((num_par, 1, 1), jnp.float32),
        grid_spec=pltpu.PrefetchScalarGridSpec(
            num_scalar_prefetch=0,
            grid=(num_par, inner_tiles),
            in_specs=[
                pl.BlockSpec((tile_n, c), idx),   # logits tile
                pl.BlockSpec((tile_n, 1), idx),   # targets tile
                pl.BlockSpec((tile_n, 1), idx),   # alpha_t tile
            ],
            out_specs=pl.BlockSpec((1, 1, 1), lambda p_, j_: (p_, 0, 0)),
            scratch_shapes=[pltpu.VMEM((tile_n, 1), jnp.float32)],  # per-row partial sums
        ),
        compiler_params=pltpu.CompilerParams(
            dimension_semantics=("parallel", "arbitrary"),
            vmem_limit_bytes=vmem_limit,
        ),
    )(logits, targets2d, alpha_t2d)

    total = jnp.sum(partials)
    if reduction == "mean":
        return total / jnp.float32(n)
    elif reduction == "sum":
        return total
    else:
        raise NotImplementedError("reduction='none' not supported by the Pallas kernel")


def _focal_loss_ref(logits, targets, alpha=None, gamma=2.0):
    """Pure-JAX reference matching the PyTorch module (reduction='mean')."""
    logits = logits.astype(jnp.float32)
    lse = jax.nn.logsumexp(logits, axis=-1)
    tgt_logit = jnp.take_along_axis(logits, targets[:, None], axis=-1)[:, 0]
    ce = lse - tgt_logit
    pt = jnp.exp(-ce)
    alpha_t = 1.0 if alpha is None else jnp.asarray(alpha, jnp.float32)[targets]
    fl = alpha_t * (1.0 - pt) ** gamma * ce
    return jnp.mean(fl)


if __name__ == "__main__":
    key = jax.random.PRNGKey(0)
    k1, k2, k3, k4 = jax.random.split(key, 4)

    # Primary case: per-class alpha, gamma=2, reduction='mean'.
    N, C = 16, 8
    logits = jax.random.normal(k1, (N, C), dtype=jnp.float32)
    targets = jax.random.randint(k2, (N,), 0, C, dtype=jnp.int32)
    alpha = jnp.linspace(0.5, 1.5, C, dtype=jnp.float32)

    out = focal_loss(logits, targets, alpha, gamma=2.0)
    out = jax.block_until_ready(out)
    ref = _focal_loss_ref(logits, targets, alpha, gamma=2.0)
    assert jnp.allclose(out, ref, rtol=1e-5, atol=1e-5), (out, ref)

    # Ragged batch, alpha=None: exercises the row mask, clamped padded grid points,
    # and the 2-D (parallel, arbitrary) grid.
    N2, C2 = 100, 12
    logits2 = jax.random.normal(k3, (N2, C2), dtype=jnp.float32)
    targets2 = jax.random.randint(k4, (N2,), 0, C2, dtype=jnp.int32)
    out2 = focal_loss(logits2, targets2, None, gamma=2.0, tile_n=40)
    out2 = jax.block_until_ready(out2)
    ref2 = _focal_loss_ref(logits2, targets2, None, gamma=2.0)
    assert jnp.allclose(out2, ref2, rtol=1e-5, atol=1e-5), (out2, ref2)

    print("KERNEL_OK")
</pallas_src>

<mosaic_0001>
module attributes {stable_mosaic.version = 11 : i64} {
  func.func @_focal_loss_kernel(%arg0: i32, %arg1: i32, %arg2: memref<16x8xf32, #tpu.memory_space<vmem>>, %arg3: memref<16x1xi32, #tpu.memory_space<vmem>>, %arg4: memref<16x1xf32, #tpu.memory_space<vmem>>, %arg5: memref<1x1x1xf32, #tpu.memory_space<vmem>>, %arg6: memref<16x1xf32, #tpu.memory_space<vmem>>) attributes {dimension_semantics = [#tpu.dimension_semantics<parallel>, #tpu.dimension_semantics<arbitrary>], iteration_bounds = array<i64: 1, 1>, scalar_prefetch = 0 : i64, scratch_operands = 1 : i64, tpu.core_type = #tpu.core_type<tc>, window_params = [{transform_indices = @transform_0, window_bounds = array<i64: 16, 8>}, {transform_indices = @transform_1, window_bounds = array<i64: 16, 1>}, {transform_indices = @transform_2, window_bounds = array<i64: 16, 1>}, {transform_indices = @transform_3, window_bounds = array<i64: 1, 1, 1>}]} {
    %c0_i32 = arith.constant 0 : i32
    %0 = arith.cmpi eq, %arg1, %c0_i32 : i32
    %1 = arith.extui %0 : i1 to i32
    %c0_i32_0 = arith.constant 0 : i32
    %2 = arith.cmpi ne, %1, %c0_i32_0 : i32
    scf.if %2 {
      %cst_18 = arith.constant 0.000000e+00 : f32
      %48 = vector.broadcast %cst_18 : f32 to vector<16x1xf32>
      %c0_19 = arith.constant 0 : index
      %c0_20 = arith.constant 0 : index
      %49 = vector.load %arg6[%c0_19, %c0_20] : memref<16x1xf32, #tpu.memory_space<vmem>>, vector<16x1xf32>
      tpu.vector_store %arg6[%c0_19, %c0_20], %48 {strides = array<i32>} : memref<16x1xf32, #tpu.memory_space<vmem>>, vector<16x1xf32>,
    } else {
    }
    %c0 = arith.constant 0 : index
    %c0_1 = arith.constant 0 : index
    %3 = vector.load %arg2[%c0, %c0_1] : memref<16x8xf32, #tpu.memory_space<vmem>>, vector<16x8xf32>
    %c0_2 = arith.constant 0 : index
    %c0_3 = arith.constant 0 : index
    %4 = vector.load %arg3[%c0_2, %c0_3] : memref<16x1xi32, #tpu.memory_space<vmem>>, vector<16x1xi32>
    %c0_4 = arith.constant 0 : index
    %c0_5 = arith.constant 0 : index
    %5 = vector.load %arg4[%c0_4, %c0_5] : memref<16x1xf32, #tpu.memory_space<vmem>>, vector<16x1xf32>
    %cst = arith.constant dense<0xFF800000> : vector<16xf32>
    %6 = vector.multi_reduction <maximumf>, %3, %cst [1] : vector<16x8xf32> to vector<16xf32>
    %7 = vector.shape_cast %6 : vector<16xf32> to vector<16x1xf32>
    %8 = vector.broadcast %7 : vector<16x1xf32> to vector<16x8xf32>
    %9 = arith.subf %3, %8 : vector<16x8xf32>
    %10 = math.exp %9 : vector<16x8xf32>
    %cst_6 = arith.constant dense<0.000000e+00> : vector<16xf32>
    %11 = vector.multi_reduction <add>, %10, %cst_6 [1] : vector<16x8xf32> to vector<16xf32>
    %12 = vector.shape_cast %11 : vector<16xf32> to vector<16x1xf32>
    %13 = math.log %12 : vector<16x1xf32>
    %14 = arith.addf %13, %7 : vector<16x1xf32>
    %15 = tpu.iota {dimensions = array<i32: 1>} : vector<16x8xi32>
    %16 = vector.broadcast %4 : vector<16x1xi32> to vector<16x8xi32>
    %17 = arith.cmpi eq, %15, %16 : vector<16x8xi32>
    %18 = arith.extui %17 : vector<16x8xi1> to vector<16x8xi32>
    %19 = arith.sitofp %18 : vector<16x8xi32> to vector<16x8xf32>
    %20 = arith.mulf %19, %3 : vector<16x8xf32>
    %cst_7 = arith.constant dense<0.000000e+00> : vector<16xf32>
    %21 = vector.multi_reduction <add>, %20, %cst_7 [1] : vector<16x8xf32> to vector<16xf32>
    %22 = vector.shape_cast %21 : vector<16xf32> to vector<16x1xf32>
    %23 = arith.subf %14, %22 : vector<16x1xf32>
    %cst_8 = arith.constant 0.000000e+00 : f32
    %24 = vector.broadcast %cst_8 : f32 to vector<16x1xf32>
    %25 = arith.subf %24, %23 : vector<16x1xf32>
    %26 = math.exp %25 : vector<16x1xf32>
    %cst_9 = arith.constant 1.000000e+00 : f32
    %27 = vector.broadcast %cst_9 : f32 to vector<16x1xf32>
    %28 = arith.subf %27, %26 : vector<16x1xf32>
    %29 = arith.mulf %28, %28 : vector<16x1xf32>
    %30 = arith.mulf %5, %29 : vector<16x1xf32>
    %31 = arith.mulf %30, %23 : vector<16x1xf32>
    %c1_i32 = arith.constant 1 : i32
    %32 = arith.muli %arg0, %c1_i32 : i32
    %33 = arith.addi %32, %arg1 : i32
    %c16_i32 = arith.constant 16 : i32
    %34 = arith.muli %33, %c16_i32 : i32
    %35 = tpu.iota {dimensions = array<i32: 0>} : vector<16x1xi32>
    %36 = vector.broadcast %34 : i32 to vector<16x1xi32>
    %37 = arith.addi %35, %36 : vector<16x1xi32>
    %c16_i32_10 = arith.constant 16 : i32
    %38 = vector.broadcast %c16_i32_10 : i32 to vector<16x1xi32>
    %39 = arith.cmpi slt, %37, %38 : vector<16x1xi32>
    %cst_11 = arith.constant 0.000000e+00 : f32
    %40 = vector.broadcast %cst_11 : f32 to vector<16x1xf32>
    %41 = arith.select %39, %31, %40 : vector<16x1xi1>, vector<16x1xf32>
    %c0_12 = arith.constant 0 : index
    %c0_13 = arith.constant 0 : index
    %42 = vector.load %arg6[%c0_12, %c0_13] : memref<16x1xf32, #tpu.memory_space<vmem>>, vector<16x1xf32>
    %43 = arith.addf %42, %41 : vector<16x1xf32>
    %c0_14 = arith.constant 0 : index
    %c0_15 = arith.constant 0 : index
    %44 = vector.load %arg6[%c0_14, %c0_15] : memref<16x1xf32, #tpu.memory_space<vmem>>, vector<16x1xf32>
    tpu.vector_store %arg6[%c0_14, %c0_15], %43 {strides = array<i32>} : memref<16x1xf32, #tpu.memory_space<vmem>>, vector<16x1xf32>,
    %c0_i32_16 = arith.constant 0 : i32
    %45 = arith.cmpi eq, %arg1, %c0_i32_16 : i32
    %46 = arith.extui %45 : i1 to i32
    %c0_i32_17 = arith.constant 0 : i32
    %47 = arith.cmpi ne, %46, %c0_i32_17 : i32
    scf.if %47 {
      %c0_18 = arith.constant 0 : index
      %c0_19 = arith.constant 0 : index
      %48 = vector.load %arg6[%c0_18, %c0_19] : memref<16x1xf32, #tpu.memory_space<vmem>>, vector<16x1xf32>
      %49 = vector.shape_cast %48 : vector<16x1xf32> to vector<1x16x1xf32>
      %cst_20 = arith.constant dense<0.000000e+00> : vector<1xf32>
      %50 = vector.multi_reduction <add>, %49, %cst_20 [1, 2] : vector<1x16x1xf32> to vector<1xf32>
      %51 = vector.shape_cast %50 : vector<1xf32> to vector<1x1x1xf32>
      %52 = vector.extract %51[0, 0, 0] : f32 from vector<1x1x1xf32>
      %53 = vector.broadcast %52 : f32 to vector<1x1x1xf32>
      %c0_21 = arith.constant 0 : index
      %c0_22 = arith.constant 0 : index
      %c0_23 = arith.constant 0 : index
      %54 = vector.load %arg5[%c0_21, %c0_22, %c0_23] : memref<1x1x1xf32, #tpu.memory_space<vmem>>, vector<1x1x1xf32>
      tpu.vector_store %arg5[%c0_21, %c0_22, %c0_23], %53 {strides = array<i32>} : memref<1x1x1xf32, #tpu.memory_space<vmem>>, vector<1x1x1xf32>,
    } else {
    }
    return
  }
  func.func @transform_0(%arg0: i32, %arg1: i32) -> (i32, i32) {
    %c1_i32 = arith.constant 1 : i32
    %0 = arith.muli %arg0, %c1_i32 : i32
    %1 = arith.addi %0, %arg1 : i32
    %c0_i32 = arith.constant 0 : i32
    %2 = arith.minsi %1, %c0_i32 : i32
    %c0_i32_0 = arith.constant 0 : i32
    %c0_i32_1 = arith.constant 0 : i32
    return %2, %c0_i32_0 : i32, i32
  }
  func.func @transform_1(%arg0: i32, %arg1: i32) -> (i32, i32) {
    %c1_i32 = arith.constant 1 : i32
    %0 = arith.muli %arg0, %c1_i32 : i32
    %1 = arith.addi %0, %arg1 : i32
    %c0_i32 = arith.constant 0 : i32
    %2 = arith.minsi %1, %c0_i32 : i32
    %c0_i32_0 = arith.constant 0 : i32
    %c0_i32_1 = arith.constant 0 : i32
    return %2, %c0_i32_0 : i32, i32
  }
  func.func @transform_2(%arg0: i32, %arg1: i32) -> (i32, i32) {
    %c1_i32 = arith.constant 1 : i32
    %0 = arith.muli %arg0, %c1_i32 : i32
    %1 = arith.addi %0, %arg1 : i32
    %c0_i32 = arith.constant 0 : i32
    %2 = arith.minsi %1, %c0_i32 : i32
    %c0_i32_0 = arith.constant 0 : i32
    %c0_i32_1 = arith.constant 0 : i32
    return %2, %c0_i32_0 : i32, i32
  }
  func.func @transform_3(%arg0: i32, %arg1: i32) -> (i32, i32, i32) {
    %c0_i32 = arith.constant 0 : i32
    %c0_i32_0 = arith.constant 0 : i32
    %c0_i32_1 = arith.constant 0 : i32
    return %arg0, %c0_i32, %c0_i32_0 : i32, i32, i32
  }
}

</mosaic_0001>

<bundles_post_ra>
// kernel: tpu_custom_call.1
= control target key start
LH: loop header
LB: loop body
LE: loop exit
PB: predicated region body
PF: predicated region fallthrough
CT: control target
= control target key end

     0   :  { %vm124_vm0 = vcmask 64512   ;;  %v303_v4 = vmov 0   ;;  %s368_s0 = inlined_call_operand.vmem [shape: f32[16,8], index: 0, kind: input, shape index: {}]   ;;  %s369_s1 = inlined_call_operand.vmem [shape: s32[16,1], index: 1, kind: input, shape index: {}]   ;;  %s370_s2 = inlined_call_operand.vmem [shape: f32[16,1], index: 2, kind: input, shape index: {}]   ;;  %s371_s3 = inlined_call_operand.hbm [shape: f32[1,1,1], index: 3, kind: output, shape index: {}]  }
   0x1   :  { %v118_v0 = vld [vmem:[%s368_s0] sm:$0xff]  ;;  %v119_v1 = vld [vmem:[%s368_s0 + $0x8] sm:$0xff]  ;;  %265 = vset.pattern.permute.xlu1 %v303_v4  ;;  %266 = vset.pattern.permute.xlu0 %v303_v4 }
   0x2   :  { %v120_v2 = vld [vmem:[%s369_s1] sm:$0xff]  ;;  %v125_v3 = vsel %vm124_vm0, %v118_v0, -inf }
   0x3   :  { %8 = vsyncpa [#allocation4], 0  ;;  %126 = vmax.xlane.f32.xlu0 %v125_v3  ;;  %152 = vperm.xlu1 %265, %v120_v2   ;;  %v128_v5 = vsel %vm124_vm0, %v119_v1, -inf  ;;  %v121_v6 = vld [vmem:[%s369_s1 + $0x8] sm:$0xff]  ;;  %vm115_vm1 = vcmask 7168   ;;  %v304_v7 = vmov 0.0   ;;  %v149_v9 = vlaneseq }
   0x4   :  { %116 = vst.msk [vmem:[#allocation2] sm:$0xff] %vm115_vm1, %v304_v7  ;;  %117 = vst.msk [vmem:[#allocation2 + $0x8] sm:$0xff] %vm115_vm1, %v304_v7  ;;  %v122_v46 = vld [vmem:[%s370_s2] sm:$0xff]  ;;  %v123_v52 = vld [vmem:[%s370_s2 + $0x8] sm:$0xff]  ;;  %s305_s2 = smov [#allocation3]   ;;  %vm224_vm4 = vcmask 0  }
   0x5   :  { %v150_v14 = vand.u32 127, %v149_v9  ;;  %s232_s22 = sshll.u32 %s305_s2, 4  ;;  %s233_s22 = int_to_ptr.vmem [resolvable:$true] %s232_s22 }
   0x6   :  { %s279_s24 = scalar_lea.vmem %s233_s22, 16  ;;  %s283_s25 = scalar_lea.vmem %s233_s22, 32 }
   0x7   :  { %129 = vmax.xlane.f32.xlu0 %v128_v5  ;;  %155 = vperm.xlu1 %265, %v121_v6   ;;  %p280_p0 = scmp.ne.s32.totalorder %s233_s22, %s279_s24  ;;  %p284_p1 = scmp.lt.s32.totalorder %s233_s22, %s233_s22 }
   0x8   :  { %p285_p2 = scmp.lt.s32.totalorder %s283_s25, %s279_s24 }
   0xa   :  { %p286_p3 = por %p285_p2, %p284_p1 }
   0xb   :  { %v199_v51 = vld [vmem:[#allocation2] sm:$0xff]  ;;  %v200_v57 = vld [vmem:[#allocation2 + $0x8] sm:$0xff] }
   0xc   :  { %p287_p4 = pnand %p286_p3, %p280_p0 }
  0x82   :  { %v153_v12 = vpop.permute.xlu1 %152 }
  0x83   :  { %vm157_vm2 = vcmp.eq.s32.totalorder %v150_v14, %v153_v12 }
  0x84   :  { %v258_v18 = vsel %vm157_vm2, 1.0, %v304_v7 }
  0x85   :  { %v163_v19 = vmul.f32 %v258_v18, %v118_v0 }
  0x86   :  { %v156_v17 = vpop.permute.xlu1 %155 }
  0x87   :  { %vm158_vm3 = vcmp.eq.s32.totalorder %v150_v14, %v156_v17  ;;  %v165_v23 = vsel %vm124_vm0, %v163_v19, 0.0 }
  0x88   :  { %v259_v21 = vsel %vm158_vm3, 1.0, %v304_v7 }
  0x89   :  { %v164_v24 = vmul.f32 %v259_v21, %v119_v1 }
  0x8b   :  { %v168_v27 = vsel %vm124_vm0, %v164_v24, 0.0 }
  0x90   :  { %v127_v8 = vpop.xlane.xlu0 %126 }
  0x91   :  { %v131_v10 = vsub.f32 %v118_v0, %v127_v8 }
  0x93   :  { %v133_v11 = vmul.f32 1.442695, %v131_v10 }
  0x94   :  { %v130_v13 = vpop.xlane.xlu0 %129 }
  0x95   :  { %267 = vpow2.f32 %v133_v11  ;;  %v132_v15 = vsub.f32 %v119_v1, %v130_v13 }
  0x97   :  { %v135_v16 = vmul.f32 1.442695, %v132_v15 }
  0x99   :  { %269 = vpow2.f32 %v135_v16 }
  0x9f   :  { %v268_v20 = vpop.eup %267 }
  0xa0   :  { %v137_v22 = vsel %vm124_vm0, %v268_v20, 0.0 }
  0xa1   :  { %138 = vadd.xlane.f32.xlu0 %v137_v22 }
  0xa3   :  { %v270_v25 = vpop.eup %269 }
  0xa4   :  { %v140_v26 = vsel %vm124_vm0, %v270_v25, 0.0 }
  0xa5   :  { %141 = vadd.xlane.f32.xlu1 %v140_v26  ;;  %166 = vadd.xlane.f32.xlu0 %v165_v23 }
  0xa9   :  { %169 = vadd.xlane.f32.xlu0 %v168_v27 }
 0x12e   :  { %v139_v28 = vpop.xlane.xlu0 %138 }
 0x12f   :  { %271 = vlog2.f32 %v139_v28 }
 0x132   :  { %v142_v29 = vpop.xlane.xlu1 %141  ;;  %v167_v32 = vpop.xlane.xlu0 %166 }
 0x133   :  { %273 = vlog2.f32 %v142_v29 }
 0x136   :  { %v170_v39 = vpop.xlane.xlu0 %169 }
 0x139   :  { %v272_v30 = vpop.eup %271 }
 0x13a   :  { %v144_v31 = vmul.f32 0.6931472, %v272_v30 }
 0x13c   :  { %v147_v33 = vadd.f32 %v144_v31, %v127_v8 }
 0x13d   :  { %v274_v34 = vpop.eup %273 }
 0x13e   :  { %v146_v35 = vmul.f32 0.6931472, %v274_v34  ;;  %v171_v36 = vsub.f32 %v147_v33, %v167_v32 }
 0x140   :  { %v173_v37 = vsub.f32 0.0, %v171_v36  ;;  %v148_v38 = vadd.f32 %v146_v35, %v130_v13 }
 0x142   :  { %v175_v40 = vmul.f32 1.442695, %v173_v37  ;;  %v172_v41 = vsub.f32 %v148_v38, %v170_v39 }
 0x144   :  { %275 = vpow2.f32 %v175_v40  ;;  %v174_v42 = vsub.f32 0.0, %v172_v41 }
 0x146   :  { %v177_v43 = vmul.f32 1.442695, %v174_v42 }
 0x148   :  { %277 = vpow2.f32 %v177_v43 }
 0x14e   :  { %v276_v44 = vpop.eup %275 }
 0x14f   :  { %v179_v45 = vsub.f32 1.0, %v276_v44 }
 0x151   :  { %v181_v47 = vmul.f32 %v179_v45, %v179_v45 }
 0x152   :  { %v278_v48 = vpop.eup %277 }
 0x153   :  { %v183_v49 = vmul.f32 %v181_v47, %v122_v46  ;;  %v180_v50 = vsub.f32 1.0, %v278_v48 }
 0x155   :  { %v185_v53 = vmul.f32 %v183_v49, %v171_v36  ;;  %v182_v54 = vmul.f32 %v180_v50, %v180_v50 }
 0x157   :  { %v201_v55 = vadd.f32 %v199_v51, %v185_v53  ;;  %v184_v56 = vmul.f32 %v182_v54, %v123_v52 }
 0x159   :  { %204 = vst.msk [vmem:[#allocation2] sm:$0xff] %vm115_vm1, %v201_v55  ;;  %v186_v58 = vmul.f32 %v184_v56, %v172_v41 }
 0x15b   :  { %v202_v59 = vadd.f32 %v200_v57, %v186_v58 }
 0x15d   :  { %205 = vst.msk [vmem:[#allocation2 + $0x8] sm:$0xff] %vm115_vm1, %v202_v59 }
 0x160   :  { %v209_v60 = vld [vmem:[#allocation2] sm:$0xff] }
 0x161   :  { %v211_v62 = vsel %vm115_vm1, %v209_v60, 0.0 }
 0x164   :  { %v210_v61 = vld [vmem:[#allocation2 + $0x8] sm:$0xff] }
 0x165   :  { %v212_v63 = vsel %vm115_vm1, %v210_v61, 0.0 }
 0x166   :  { %v213_v0 = vadd.f32 %v212_v63, %v211_v62 }
 0x168   :  { %214 = vadd.xlane.f32.xlu0 %v213_v0 }
 0x1f5   :  { %v215_v1 = vpop.xlane.xlu0 %214 }
 0x1f6   :  { %v216_v2 = vrot.slane %v215_v1, 4 }
 0x1f8   :  { %v217_v3 = vadd.f32 %v216_v2, %v215_v1 }
 0x1fa   :  { %v218_v4 = vrot.slane %v217_v3, 2 }
 0x1fc   :  { %v219_v5 = vadd.f32 %v218_v4, %v217_v3 }
 0x1fe   :  { %v220_v6 = vrot.slane %v219_v5, 1 }
 0x200   :  { %v221_v7 = vadd.f32 %v220_v6, %v219_v5 }
 0x202   :  { %260 = vpush %v221_v7 }
 0x233   :  { %s261_s23 = spop %260 }
 0x234   :  { %v223_v8 = vstv %s261_s23 }
 0x235   :  { %225 = vst.msk [vmem:[#allocation3] sm:$0x1] %vm224_vm4, %v223_v8 }
 0x236   :  { %290 = shalt.err (!%p287_p4)
}
 0x237   :  { %s291_s28 = scalar_lea.hbm %s371_s3, 16 }
 0x238   :  { %p292_p5 = scmp.ne.s32.totalorder %s371_s3, %s291_s28  ;;  %p295_p6 = scmp.lt.u32.totalorder %s291_s28, %s371_s3 }
 0x23a   :  { %p297_p7 = pnand %p295_p6, %p292_p5 }
 0x23c   :  { %300 = shalt.err (!%p297_p7)
}
 0x23d   :  { %235 = dma.vmem_to_hbm [thread:$0]  %s233_s22, 16, %s371_s3, [#allocation4]  }
 0x23e   :  { %301 = dma.done.wait [#allocation4], 16  }
 0x23f   :  { %302 = vsyncadd [#allocation4], 4294967280 }
 0x240   :  { %239 = vsyncpa [#allocation4], 1 }

</bundles_post_ra>
